<compile_context>
chip_gen: v7x
topology: tpu7x:2x2x1
jax: 0.10.0
libtpu: 0.0.40
codegen_flags: <defaults>
</compile_context>

<pallas_src>
import functools

import jax
import jax.numpy as jnp
from jax.experimental import pallas as pl
from jax.experimental.pallas import tpu as pltpu

_MIB = 1024 * 1024
_MIN_ROWS_PER_BLOCK = 32            # sublane-packing friendly for f32/bf16/int8
_SINGLE_BLOCK_MAX_BYTES = 4 * _MIB  # ragged arrays up to this size: one full block


def _leaky_swish_kernel(x_ref, o_ref, *, c0, c1, c2):
    # out = x * (c0 + c1 * tanh(c2 * x)); tanh runs on the EUP (its own bundle
    # slot), leaving ~4 VALU ops/element.  Compute stays in f32 even for bf16
    # I/O so accuracy holds against the reference within 1e-4.
    xf = x_ref[...].astype(jnp.float32)
    o_ref[...] = (xf * (c0 + c1 * jnp.tanh(c2 * xf))).astype(o_ref.dtype)


def _chip_profile():
    """Best-effort generation detection; falls back to settings safe everywhere."""
    vmem_bytes = None
    try:
        vmem_bytes = getattr(pltpu.get_tpu_info(), "vmem_capacity_bytes", None)
    except Exception:
        vmem_bytes = None
    kind = ""
    try:
        kind = jax.devices()[0].device_kind.lower()
    except Exception:
        kind = ""

    # 128 MiB-VMEM generations (v5e/v5p/v6e) can take bigger tiles & limits.
    big_vmem = (vmem_bytes is not None and vmem_bytes >= 100 * _MIB) or any(
        t in kind for t in ("v5", "v6"))
    # Single-TensorCore chips (v5e / v6e): extra grid steps buy no parallelism.
    single_tc = any(t in kind for t in ("v5e", "v5 lite", "v5litepod", "v6e", "v6 lite"))

    if big_vmem:
        target_tile_bytes = 8 * _MIB   # past the ~85% HBM-roofline knee
        vmem_limit_bytes = 64 * _MIB   # 2 in + 2 out buffers = 32 MiB, ample headroom
    else:                              # v7x (64 MiB/TC) or unknown: conservative
        target_tile_bytes = 4 * _MIB
        vmem_limit_bytes = 32 * _MIB
    return target_tile_bytes, vmem_limit_bytes, single_tc


def leaky_swish(x, negative_slope=0.01, sharpness=10.0):
    """Elementwise LeakySwish matching the PyTorch module's forward."""
    orig_shape = x.shape
    orig_dtype = x.dtype
    n = x.size
    if n == 0:
        return x

    negative_slope = float(negative_slope)
    sharpness = float(sharpness)
    kernel = functools.partial(
        _leaky_swish_kernel,
        c0=0.5 * (1.0 + negative_slope),
        c1=0.5 * (1.0 - negative_slope),
        c2=0.5 * sharpness,
    )

    itemsize = jnp.dtype(orig_dtype).itemsize
    target_tile_bytes, vmem_limit_bytes, single_tc = _chip_profile()
    cost = pl.CostEstimate(flops=5 * n, transcendentals=n,
                           bytes_accessed=2 * n * itemsize)

    x_flat = jnp.ravel(x)  # metadata-only for a contiguous array

    # Ragged element count (n % 128 != 0) that fits comfortably in VMEM:
    # run the whole array as one full-extent block -> no pad, no slice,
    # zero extra HBM passes.
    if n % 128 != 0 and n * itemsize <= _SINGLE_BLOCK_MAX_BYTES:
        out = pl.pallas_call(
            kernel,
            out_shape=jax.ShapeDtypeStruct((1, n), orig_dtype),
            compiler_params=pltpu.CompilerParams(
                vmem_limit_bytes=vmem_limit_bytes),
            cost_estimate=cost,
        )(x_flat.reshape(1, n))
        return out.reshape(orig_shape)

    padded_n = n
    if n % 128 != 0:
        # TODO(synk): large ragged sizes still pay a pad + slice HBM round-trip;
        # removing it needs a manual-DMA tail (memory_space=pl.ANY + masked
        # pltpu.store on the last grid step).
        padded_n = pl.cdiv(n, 128) * 128
        x_flat = jnp.pad(x_flat, (0, padded_n - n))

    # Lane width: widest multiple of 128 dividing padded_n exactly (lane-dense,
    # unmasked wide stores) while keeping at least 8 rows of sublane layout.
    lanes = 128
    for w in (2048, 1024, 512, 256):
        if padded_n % w == 0 and padded_n // w >= 8:
            lanes = w
            break
    rows = padded_n // lanes
    x2d = x_flat.reshape(rows, lanes)

    # Block rows: target a multi-MiB tile (generation dependent), multiple of 32.
    target_block_rows = max(
        _MIN_ROWS_PER_BLOCK,
        (target_tile_bytes // (lanes * itemsize))
        // _MIN_ROWS_PER_BLOCK * _MIN_ROWS_PER_BLOCK)
    block_rows = min(rows, target_block_rows)

    if not single_tc and rows >= 2 * _MIN_ROWS_PER_BLOCK:
        # Multi-TensorCore chip (v7x): ensure the "parallel" grid has enough
        # steps to shard across cores, even when one tile would fit everything.
        min_steps = 4 if rows >= 4 * _MIN_ROWS_PER_BLOCK else 2
        split_rows = max(
            _MIN_ROWS_PER_BLOCK,
            (rows // min_steps) // _MIN_ROWS_PER_BLOCK * _MIN_ROWS_PER_BLOCK)
        block_rows = min(block_rows, split_rows)

    if block_rows >= rows:
        block_rows = rows  # single block == full array dims (always legal)

    grid = (pl.cdiv(rows, block_rows),)
    out2d = pl.pallas_call(
        kernel,
        out_shape=jax.ShapeDtypeStruct((rows, lanes), orig_dtype),
        grid=grid,
        in_specs=[pl.BlockSpec((block_rows, lanes), lambda i: (i, 0))],
        out_specs=pl.BlockSpec((block_rows, lanes), lambda i: (i, 0)),
        compiler_params=pltpu.CompilerParams(
            dimension_semantics=("parallel",),
            vmem_limit_bytes=vmem_limit_bytes,
        ),
        cost_estimate=cost,
    )(x2d)

    if padded_n != n:
        return out2d.reshape(-1)[:n].reshape(orig_shape)
    return out2d.reshape(orig_shape)


def leaky_swish_ref(x, negative_slope=0.01, sharpness=10.0):
    xf = x.astype(jnp.float32)
    sig = jax.nn.sigmoid(sharpness * xf)
    return (xf * ((1.0 - negative_slope) * sig + negative_slope)).astype(x.dtype)


if __name__ == "__main__":
    key = jax.random.PRNGKey(0)
    k1, k2 = jax.random.split(key)

    # Aligned case (n % 128 == 0): tiled lane-dense path.
    x1 = jax.random.normal(k1, (2, 4, 16, 16), dtype=jnp.float32)
    out1 = jax.block_until_ready(leaky_swish(x1))
    ref1 = leaky_swish_ref(x1)
    assert out1.shape == x1.shape and out1.dtype == x1.dtype
    assert jnp.allclose(out1, ref1, atol=1e-4, rtol=1e-4), "aligned mismatch"

    # Ragged case (105 elements): single full-extent block, no pad/slice.
    x2 = jax.random.normal(k2, (3, 5, 7), dtype=jnp.float32)
    out2 = jax.block_until_ready(leaky_swish(x2))
    ref2 = leaky_swish_ref(x2)
    assert out2.shape == x2.shape and out2.dtype == x2.dtype
    assert jnp.allclose(out2, ref2, atol=1e-4, rtol=1e-4), "ragged mismatch"

    print("KERNEL_OK")
</pallas_src>

<mosaic_0001>
module attributes {stable_mosaic.version = 11 : i64} {
  func.func @_leaky_swish_kernel(%arg0: i32, %arg1: memref<8x256xf32, #tpu.memory_space<vmem>>, %arg2: memref<8x256xf32, #tpu.memory_space<vmem>>) attributes {dimension_semantics = [#tpu.dimension_semantics<parallel>], iteration_bounds = array<i64: 1>, scalar_prefetch = 0 : i64, scratch_operands = 0 : i64, tpu.core_type = #tpu.core_type<tc>, window_params = [{transform_indices = @transform_0, window_bounds = array<i64: 8, 256>}, {transform_indices = @transform_1, window_bounds = array<i64: 8, 256>}]} {
    %c0 = arith.constant 0 : index
    %c0_0 = arith.constant 0 : index
    %0 = vector.load %arg1[%c0, %c0_0] : memref<8x256xf32, #tpu.memory_space<vmem>>, vector<8x256xf32>
    %cst = arith.constant 5.000000e+00 : f32
    %1 = vector.broadcast %cst : f32 to vector<8x256xf32>
    %2 = arith.mulf %1, %0 : vector<8x256xf32>
    %3 = math.tanh %2 : vector<8x256xf32>
    %cst_1 = arith.constant 4.950000e-01 : f32
    %4 = vector.broadcast %cst_1 : f32 to vector<8x256xf32>
    %5 = arith.mulf %4, %3 : vector<8x256xf32>
    %cst_2 = arith.constant 5.050000e-01 : f32
    %6 = vector.broadcast %cst_2 : f32 to vector<8x256xf32>
    %7 = arith.addf %6, %5 : vector<8x256xf32>
    %8 = arith.mulf %0, %7 : vector<8x256xf32>
    %c0_3 = arith.constant 0 : index
    %c0_4 = arith.constant 0 : index
    %9 = vector.load %arg2[%c0_3, %c0_4] : memref<8x256xf32, #tpu.memory_space<vmem>>, vector<8x256xf32>
    tpu.vector_store %arg2[%c0_3, %c0_4], %8 {strides = array<i32>} : memref<8x256xf32, #tpu.memory_space<vmem>>, vector<8x256xf32>,
    return
  }
  func.func @transform_0(%arg0: i32) -> (i32, i32) {
    %c0_i32 = arith.constant 0 : i32
    %c0_i32_0 = arith.constant 0 : i32
    return %arg0, %c0_i32 : i32, i32
  }
  func.func @transform_1(%arg0: i32) -> (i32, i32) {
    %c0_i32 = arith.constant 0 : i32
    %c0_i32_0 = arith.constant 0 : i32
    return %arg0, %c0_i32 : i32, i32
  }
}

</mosaic_0001>

<bundles_post_ra>
// kernel: tpu_custom_call.1
= control target key start
LH: loop header
LB: loop body
LE: loop exit
PB: predicated region body
PF: predicated region fallthrough
CT: control target
= control target key end

     0   :  { %6 = vsyncpa [#allocation3], 0  ;;  %s140_s0 = inlined_call_operand.hbm [shape: f32[8,256], index: 0, kind: input, shape index: {}]   ;;  %s141_s1 = inlined_call_operand.hbm [shape: f32[8,256], index: 1, kind: output, shape index: {}]  }
   0x1   :  { %7 = vsyncpa [#allocation4], 0  ;;  %s104_s6 = smov [#allocation2]   ;;  %s56_s10 = scalar_lea.hbm %s140_s0, 256 }
   0x2   :  { %s14_s7 = sshll.u32 %s104_s6, 4  ;;  %p57_p0 = scmp.ne.s32.totalorder %s140_s0, %s56_s10  ;;  %s15_s7 = int_to_ptr.vmem [resolvable:$true] %s14_s7 }
   0x3   :  { %p60_p1 = scmp.lt.u32.totalorder %s56_s10, %s140_s0 }
   0x5   :  { %p62_p2 = pnand %p60_p1, %p57_p0 }
   0x7   :  { %65 = shalt.err (!%p62_p2)
}
   0x8   :  { %s66_s15 = scalar_lea.vmem %s15_s7, 256  ;;  %p71_p4 = scmp.lt.s32.totalorder %s15_s7, %s15_s7 }
   0x9   :  { %p67_p3 = scmp.ne.s32.totalorder %s15_s7, %s66_s15  ;;  %p72_p5 = scmp.lt.s32.totalorder %s66_s15, %s66_s15 }
   0xb   :  { %p73_p6 = por %p72_p5, %p71_p4 }
   0xd   :  { %p74_p7 = pnand %p73_p6, %p67_p3 }
   0xf   :  { %77 = shalt.err (!%p74_p7)
}
  0x10   :  { %17 = dma.hbm_to_vmem [thread:$0]  %s140_s0, 256, %s15_s7, [#allocation3]  }
  0x11   :  { %100 = dma.done.wait [#allocation3], 256  }
  0x12   :  { %101 = vsyncadd [#allocation3], 4294967040  ;;  %v21_v0 = vld [vmem:[#allocation2] sm:$0xff]  ;;  %v22_v1 = vld [vmem:[#allocation2 + $0x8] sm:$0xff]  ;;  %s105_s18 = smov [#allocation5]  }
  0x13   :  { %v23_v2 = vmul.f32 5.0, %v21_v0  ;;  %v24_v3 = vmul.f32 5.0, %v22_v1  ;;  %s41_s19 = sshll.u32 %s105_s18, 4  ;;  %s42_s19 = int_to_ptr.vmem [resolvable:$true] %s41_s19 }
  0x14   :  { %s78_s0 = scalar_lea.vmem %s42_s19, 256  ;;  %p83_p9 = scmp.lt.s32.totalorder %s42_s19, %s42_s19 }
  0x15   :  { %52 = vtanh.f32 %v23_v2  ;;  %p79_p8 = scmp.ne.s32.totalorder %s42_s19, %s78_s0  ;;  %p84_p10 = scmp.lt.s32.totalorder %s78_s0, %s78_s0 }
  0x16   :  { %54 = vtanh.f32 %v24_v3 }
  0x17   :  { %p85_p11 = por %p84_p10, %p83_p9 }
  0x19   :  { %p86_p12 = pnand %p85_p11, %p79_p8 }
  0x1f   :  { %v53_v4 = vpop.eup %52 }
  0x20   :  { %v55_v5 = vpop.eup %54  ;;  %v27_v6 = vmul.f32 0.495, %v53_v4 }
  0x21   :  { %v28_v7 = vmul.f32 0.495, %v55_v5 }
  0x22   :  { %v29_v8 = vadd.f32 0.505, %v27_v6 }
  0x23   :  { %v30_v9 = vadd.f32 0.505, %v28_v7 }
  0x24   :  { %v31_v10 = vmul.f32 %v29_v8, %v21_v0 }
  0x25   :  { %v32_v11 = vmul.f32 %v30_v9, %v22_v1 }
  0x26   :  { %33 = vst [vmem:[#allocation5] sm:$0xff] %v31_v10 }
  0x27   :  { %34 = vst [vmem:[#allocation5 + $0x8] sm:$0xff] %v32_v11 }
  0x28   :  { %89 = shalt.err (!%p86_p12)
}
  0x29   :  { %s90_s22 = scalar_lea.hbm %s141_s1, 256 }
  0x2a   :  { %p91_p13 = scmp.ne.s32.totalorder %s141_s1, %s90_s22  ;;  %p94_p0 = scmp.lt.u32.totalorder %s90_s22, %s141_s1 }
  0x2c   :  { %p96_p1 = pnand %p94_p0, %p91_p13 }
  0x2e   :  { %99 = shalt.err (!%p96_p1)
}
  0x2f   :  { %44 = dma.vmem_to_hbm [thread:$0]  %s42_s19, 256, %s141_s1, [#allocation4]  }
  0x30   :  { %102 = dma.done.wait [#allocation4], 256  }
  0x31   :  { %103 = vsyncadd [#allocation4], 4294967040 }
  0x32   :  { %48 = vsyncpa [#allocation3], 1 }
  0x33   :  { %49 = vsyncpa [#allocation4], 1 }

</bundles_post_ra>
